<compile_context>
chip_gen: v5e
topology: v5e:2x2
jax: 0.10.0
libtpu: 0.0.40
codegen_flags: <defaults>
</compile_context>

<pallas_src>
import functools

import numpy as np

import jax
import jax.numpy as jnp
from jax.experimental import pallas as pl
from jax.experimental.pallas import tpu as pltpu

LANE = 128


def _round_up(x, m):
    return ((x + m - 1) // m) * m


def _im2col_nhwc(x_nhwc, K, stride, pad):
    """Channel-last patches for layer 1 (cheap XLA slicing on the small raw input).

    Returns (N*OH*OW, K*K*C) with rows ordered (n, oh, ow) and columns ordered
    (kh, kw, c)."""
    N, H, W, C = x_nhwc.shape
    OH = (H + 2 * pad - K) // stride + 1
    OW = (W + 2 * pad - K) // stride + 1
    xp = jnp.pad(x_nhwc, ((0, 0), (pad, pad), (pad, pad), (0, 0)))
    taps = []
    for kh in range(K):
        for kw in range(K):
            taps.append(
                xp[:, kh:kh + stride * (OH - 1) + 1:stride,
                   kw:kw + stride * (OW - 1) + 1:stride, :])
    p = jnp.concatenate(taps, axis=-1)          # (N, OH, OW, K*K*C)
    return p.reshape(N * OH * OW, K * K * C), OH, OW


def _tap_table(m2, ow2):
    """Static per-tap (window_offset, needs_row_mask, needs_col_mask) table.

    y1 rows are phase-ordered [EE, EO, OE, OO] (E/O = even/odd layer-1 output
    row / col), each phase block holding M2 rows in (n, oh2, ow2) order.  Tap
    (kh, kw) of the k=3/s=2/p=1 second conv reads exactly one phase block,
    shifted down by sr*OW2 + sc rows (sr = kh==0, sc = kw==0); rows that would
    fall into the conv-2 zero padding are masked to 0 afterwards."""
    table = []
    for kh in range(3):
        for kw in range(3):
            sr = 1 if kh == 0 else 0            # reads row index oh-1
            sc = 1 if kw == 0 else 0            # reads col index ow-1
            rphase = 0 if kh == 1 else 1        # 0 = even rows, 1 = odd rows
            cphase = 0 if kw == 1 else 1
            base = (2 * rphase + cphase) * m2
            off = base - (sr * ow2 + sc)
            table.append((off, bool(sr), bool(sc)))
    return tuple(table)


def _bn_relu(y, gamma, beta):
    """Training-mode BatchNorm (per-channel batch stats over all rows) + ReLU.

    Applied as a single per-channel FMA; all math in f32 (v5e-safe epilogue)."""
    mean = jnp.mean(y, axis=0, keepdims=True)
    var = jnp.mean((y - mean) ** 2, axis=0, keepdims=True)
    scale = gamma * jax.lax.rsqrt(var + 1e-5)                # (1, C)
    shift = beta - mean * scale
    return jnp.maximum(y * scale + shift, 0.0)


def _double_conv_kernel(p1_ref, w1_ref, g1_ref, b1_ref,
                        w2_ref, g2_ref, b2_ref, rowok_ref, colok_ref,
                        o_ref, y1s_ref, *, m2, tap_table):
    # ---- layer 1: conv-as-matmul (bf16 operands, f32 acc) + BN + ReLU -------
    y1 = jnp.dot(p1_ref[...], w1_ref[...], preferred_element_type=jnp.float32)
    y1 = _bn_relu(y1, g1_ref[...], b1_ref[...])              # (M1, C1P) f32
    y1s_ref[...] = y1                                        # phase-ordered, stays in VMEM

    # ---- layer 2: tap gather = contiguous window reads of the phase-ordered
    #      y1 scratch + per-row padding masks; one long-contraction MXU dot ---
    row_ok = rowok_ref[...]                                  # (M2, 1) f32, 0 where oh2 == 0
    col_ok = colok_ref[...]                                  # (M2, 1) f32, 0 where ow2 == 0
    both_ok = row_ok * col_ok

    parts = []
    for off, need_r, need_c in tap_table:                    # static 3x3 tap loop
        win = y1s_ref[pl.ds(off, m2), :]                     # (M2, C1P) f32
        if need_r and need_c:
            win = win * both_ok
        elif need_r:
            win = win * row_ok
        elif need_c:
            win = win * col_ok
        parts.append(win.astype(jnp.bfloat16))
    p2 = jnp.concatenate(parts, axis=1)                      # (M2, 9*C1P), 128-aligned concat

    acc = jnp.dot(p2, w2_ref[...], preferred_element_type=jnp.float32)  # (M2, OC2) f32
    o_ref[...] = _bn_relu(acc, g2_ref[...], b2_ref[...]).astype(o_ref.dtype)


def double_conv(x, params, *, kernel=3, stride=2, pad=1):
    """x: NCHW (PyTorch convention). params = ((w1,b1,g1,beta1),(w2,b2,g2,beta2)).

    NOTE: conv biases b1/b2 are accepted but unused: with training-mode
    BatchNorm the batch-mean subtraction cancels them exactly."""
    assert kernel == 3 and stride == 2 and pad == 1, "phase-gather path assumes k=3, s=2, p=1"
    (w1, _b1, g1, be1), (w2, _b2, g2, be2) = params
    N, C, H, W = x.shape
    OC1 = w1.shape[0]
    OC2 = w2.shape[0]
    K = kernel

    # single layout change at the PyTorch API edge; channel-last from here on
    x_nhwc = jnp.transpose(x, (0, 2, 3, 1))

    # layer-1 im2col on the tiny raw input (rows = (n, oh1, ow1), cols = (kh,kw,c))
    p1, OH1, OW1 = _im2col_nhwc(x_nhwc, K, stride, pad)
    K1 = p1.shape[1]
    OH2 = (OH1 + 2 * pad - K) // stride + 1
    OW2 = (OW1 + 2 * pad - K) // stride + 1
    M2 = N * OH2 * OW2
    assert OH1 == 2 * OH2 and OW1 == 2 * OW2, "phase decomposition needs even layer-1 output dims"

    # phase-major reorder of the layer-1 OUTPUT rows: [EE, EO, OE, OO], each
    # block (n, oh2, ow2)-ordered.  Row order is free (BN stats are order-
    # independent) and makes every layer-2 tap a contiguous window in-kernel.
    p1_img = p1.reshape(N, OH1, OW1, K1)
    phase_blocks = [p1_img[:, pr::2, pc::2, :].reshape(M2, K1)
                    for pr in (0, 1) for pc in (0, 1)]
    p1_ph = jnp.concatenate(phase_blocks, axis=0).astype(jnp.bfloat16)   # (M1, K1) bf16, K1 unpadded

    # layer-1 channels padded to one 128-lane tile (keeps the in-kernel gather /
    # concat tile-aligned); layer-2 output channels stay unpadded.
    C1P = _round_up(OC1, LANE)
    w1m = jnp.transpose(w1, (2, 3, 1, 0)).reshape(K1, OC1)
    w1m = jnp.pad(w1m, ((0, 0), (0, C1P - OC1))).astype(jnp.bfloat16)    # (K1, C1P)
    g1p = jnp.pad(g1, (0, C1P - OC1)).reshape(1, C1P).astype(jnp.float32)
    be1p = jnp.pad(be1, (0, C1P - OC1)).reshape(1, C1P).astype(jnp.float32)

    w2t = jnp.transpose(w2, (2, 3, 1, 0)).reshape(K * K, OC1, OC2)       # (tap, ic, oc)
    w2m = jnp.pad(w2t, ((0, 0), (0, C1P - OC1), (0, 0)))
    w2m = w2m.reshape(K * K * C1P, OC2).astype(jnp.bfloat16)             # (9*C1P, OC2)
    g2p = g2.reshape(1, OC2).astype(jnp.float32)
    be2p = be2.reshape(1, OC2).astype(jnp.float32)

    # per-row validity masks for the conv-2 zero padding (tiny, built host-side)
    ridx = np.arange(M2)
    oh_idx = (ridx % (OH2 * OW2)) // OW2
    ow_idx = ridx % OW2
    row_ok = jnp.asarray((oh_idx > 0).astype(np.float32).reshape(M2, 1))
    col_ok = jnp.asarray((ow_idx > 0).astype(np.float32).reshape(M2, 1))

    kern = functools.partial(_double_conv_kernel, m2=M2,
                             tap_table=_tap_table(M2, OW2))
    full = lambda shape: pl.BlockSpec(shape, lambda i: (0, 0))

    out = pl.pallas_call(
        kern,
        out_shape=jax.ShapeDtypeStruct((M2, OC2), jnp.float32),
        grid=(1,),
        in_specs=[
            full(p1_ph.shape), full(w1m.shape), full(g1p.shape), full(be1p.shape),
            full(w2m.shape), full(g2p.shape), full(be2p.shape),
            full(row_ok.shape), full(col_ok.shape),
        ],
        out_specs=full((M2, OC2)),
        scratch_shapes=[pltpu.VMEM((4 * M2, C1P), jnp.float32)],   # phase-ordered y1
        compiler_params=pltpu.CompilerParams(
            dimension_semantics=("arbitrary",),
            vmem_limit_bytes=32 * 1024 * 1024),
    )(p1_ph, w1m, g1p, be1p, w2m, g2p, be2p, row_ok, col_ok)

    # back to NCHW only at the API edge
    out = out.reshape(N, OH2, OW2, OC2)
    return jnp.transpose(out, (0, 3, 1, 2))


def _ref_block(x, w, b, g, beta, stride, pad):
    """Pure-JAX f32 reference for one Conv2d + BatchNorm2d(train) + ReLU block."""
    y = jax.lax.conv_general_dilated(
        x, w, (stride, stride), [(pad, pad), (pad, pad)],
        dimension_numbers=("NCHW", "OIHW", "NCHW"))
    y = y + b[None, :, None, None]
    mean = y.mean(axis=(0, 2, 3), keepdims=True)
    var = ((y - mean) ** 2).mean(axis=(0, 2, 3), keepdims=True)
    y = (y - mean) * jax.lax.rsqrt(var + 1e-5) * g[None, :, None, None] \
        + beta[None, :, None, None]
    return jnp.maximum(y, 0.0)


if __name__ == "__main__":
    N, IC, OC, H, W = 2, 4, 8, 16, 16
    K = 3

    key = jax.random.PRNGKey(0)
    k1, k2, k3, k4, kx = jax.random.split(key, 5)
    w1 = jax.random.normal(k1, (OC, IC, K, K), jnp.float32) * 0.1
    b1 = jax.random.normal(k2, (OC,), jnp.float32) * 0.01
    g1 = jnp.ones((OC,), jnp.float32)
    be1 = jnp.zeros((OC,), jnp.float32)
    w2 = jax.random.normal(k3, (OC, OC, K, K), jnp.float32) * 0.1
    b2 = jax.random.normal(k4, (OC,), jnp.float32) * 0.01
    g2 = jnp.ones((OC,), jnp.float32)
    be2 = jnp.zeros((OC,), jnp.float32)
    params = ((w1, b1, g1, be1), (w2, b2, g2, be2))

    x = jax.random.normal(kx, (N, IC, H, W), jnp.float32)

    out = jax.block_until_ready(double_conv(x, params))

    # correctness check against an f32 pure-JAX reference; tolerance reflects
    # bf16 MXU operands (f32 accumulation / f32 BN+ReLU epilogue in the kernel)
    ref = _ref_block(x, w1, b1, g1, be1, 2, 1)
    ref = _ref_block(ref, w2, b2, g2, be2, 2, 1)
    assert out.shape == (N, OC, H // 4, W // 4), out.shape
    assert jnp.allclose(out, ref, atol=5e-2, rtol=5e-2)

    print("KERNEL_OK")
</pallas_src>

<mosaic_0001>
module attributes {stable_mosaic.version = 11 : i64} {
  func.func @_double_conv_kernel(%arg0: i32, %arg1: memref<128x36xbf16, #tpu.memory_space<vmem>>, %arg2: memref<36x128xbf16, #tpu.memory_space<vmem>>, %arg3: memref<1x128xf32, #tpu.memory_space<vmem>>, %arg4: memref<1x128xf32, #tpu.memory_space<vmem>>, %arg5: memref<1152x8xbf16, #tpu.memory_space<vmem>>, %arg6: memref<1x8xf32, #tpu.memory_space<vmem>>, %arg7: memref<1x8xf32, #tpu.memory_space<vmem>>, %arg8: memref<32x1xf32, #tpu.memory_space<vmem>>, %arg9: memref<32x1xf32, #tpu.memory_space<vmem>>, %arg10: memref<32x8xf32, #tpu.memory_space<vmem>>, %arg11: memref<128x128xf32, #tpu.memory_space<vmem>>) attributes {dimension_semantics = [#tpu.dimension_semantics<arbitrary>], iteration_bounds = array<i64: 1>, scalar_prefetch = 0 : i64, scratch_operands = 1 : i64, tpu.core_type = #tpu.core_type<tc>, window_params = [{pipeline_mode = #tpu.pipeline_mode<synchronous>, transform_indices = @transform_0, window_bounds = array<i64: 128, 36>}, {pipeline_mode = #tpu.pipeline_mode<synchronous>, transform_indices = @transform_1, window_bounds = array<i64: 36, 128>}, {pipeline_mode = #tpu.pipeline_mode<synchronous>, transform_indices = @transform_2, window_bounds = array<i64: 1, 128>}, {pipeline_mode = #tpu.pipeline_mode<synchronous>, transform_indices = @transform_3, window_bounds = array<i64: 1, 128>}, {pipeline_mode = #tpu.pipeline_mode<synchronous>, transform_indices = @transform_4, window_bounds = array<i64: 1152, 8>}, {pipeline_mode = #tpu.pipeline_mode<synchronous>, transform_indices = @transform_5, window_bounds = array<i64: 1, 8>}, {pipeline_mode = #tpu.pipeline_mode<synchronous>, transform_indices = @transform_6, window_bounds = array<i64: 1, 8>}, {pipeline_mode = #tpu.pipeline_mode<synchronous>, transform_indices = @transform_7, window_bounds = array<i64: 32, 1>}, {pipeline_mode = #tpu.pipeline_mode<synchronous>, transform_indices = @transform_8, window_bounds = array<i64: 32, 1>}, {pipeline_mode = #tpu.pipeline_mode<synchronous>, transform_indices = @transform_9, window_bounds = array<i64: 32, 8>}]} {
    %c0 = arith.constant 0 : index
    %c0_0 = arith.constant 0 : index
    %0 = vector.load %arg1[%c0, %c0_0] : memref<128x36xbf16, #tpu.memory_space<vmem>>, vector<128x36xbf16>
    %c0_1 = arith.constant 0 : index
    %c0_2 = arith.constant 0 : index
    %1 = vector.load %arg2[%c0_1, %c0_2] : memref<36x128xbf16, #tpu.memory_space<vmem>>, vector<36x128xbf16>
    %cst = arith.constant dense<0.000000e+00> : vector<128x128xf32>
    %2 = tpu.matmul %0, %1, %cst {dimension_numbers = #tpu.dot_dimension_numbers<[1], [0], [0], [1], [0, 0, 1, 1], [], []>} : vector<128x36xbf16>, vector<36x128xbf16>, vector<128x128xf32> -> vector<128x128xf32>
    %c0_3 = arith.constant 0 : index
    %c0_4 = arith.constant 0 : index
    %3 = vector.load %arg3[%c0_3, %c0_4] : memref<1x128xf32, #tpu.memory_space<vmem>>, vector<1x128xf32>
    %c0_5 = arith.constant 0 : index
    %c0_6 = arith.constant 0 : index
    %4 = vector.load %arg4[%c0_5, %c0_6] : memref<1x128xf32, #tpu.memory_space<vmem>>, vector<1x128xf32>
    %cst_7 = arith.constant dense<0.000000e+00> : vector<128xf32>
    %5 = vector.multi_reduction <add>, %2, %cst_7 [0] : vector<128x128xf32> to vector<128xf32>
    %6 = vector.shape_cast %5 : vector<128xf32> to vector<1x128xf32>
    %cst_8 = arith.constant 1.280000e+02 : f32
    %7 = vector.broadcast %cst_8 : f32 to vector<1x128xf32>
    %8 = arith.divf %6, %7 : vector<1x128xf32>
    %9 = vector.broadcast %8 : vector<1x128xf32> to vector<128x128xf32>
    %10 = arith.subf %2, %9 : vector<128x128xf32>
    %11 = arith.mulf %10, %10 : vector<128x128xf32>
    %cst_9 = arith.constant dense<0.000000e+00> : vector<128xf32>
    %12 = vector.multi_reduction <add>, %11, %cst_9 [0] : vector<128x128xf32> to vector<128xf32>
    %13 = vector.shape_cast %12 : vector<128xf32> to vector<1x128xf32>
    %cst_10 = arith.constant 1.280000e+02 : f32
    %14 = vector.broadcast %cst_10 : f32 to vector<1x128xf32>
    %15 = arith.divf %13, %14 : vector<1x128xf32>
    %cst_11 = arith.constant 9.99999974E-6 : f32
    %16 = vector.broadcast %cst_11 : f32 to vector<1x128xf32>
    %17 = arith.addf %15, %16 : vector<1x128xf32>
    %18 = math.rsqrt %17 : vector<1x128xf32>
    %19 = arith.mulf %3, %18 : vector<1x128xf32>
    %20 = arith.mulf %8, %19 : vector<1x128xf32>
    %21 = arith.subf %4, %20 : vector<1x128xf32>
    %22 = vector.broadcast %19 : vector<1x128xf32> to vector<128x128xf32>
    %23 = arith.mulf %2, %22 : vector<128x128xf32>
    %24 = vector.broadcast %21 : vector<1x128xf32> to vector<128x128xf32>
    %25 = arith.addf %23, %24 : vector<128x128xf32>
    %cst_12 = arith.constant 0.000000e+00 : f32
    %26 = vector.broadcast %cst_12 : f32 to vector<128x128xf32>
    %27 = arith.maximumf %25, %26 : vector<128x128xf32>
    %c0_13 = arith.constant 0 : index
    %c0_14 = arith.constant 0 : index
    %28 = vector.load %arg11[%c0_13, %c0_14] : memref<128x128xf32, #tpu.memory_space<vmem>>, vector<128x128xf32>
    tpu.vector_store %arg11[%c0_13, %c0_14], %27 {strides = array<i32>} : memref<128x128xf32, #tpu.memory_space<vmem>>, vector<128x128xf32>,
    %c0_15 = arith.constant 0 : index
    %c0_16 = arith.constant 0 : index
    %29 = vector.load %arg8[%c0_15, %c0_16] : memref<32x1xf32, #tpu.memory_space<vmem>>, vector<32x1xf32>
    %c0_17 = arith.constant 0 : index
    %c0_18 = arith.constant 0 : index
    %30 = vector.load %arg9[%c0_17, %c0_18] : memref<32x1xf32, #tpu.memory_space<vmem>>, vector<32x1xf32>
    %31 = arith.mulf %29, %30 : vector<32x1xf32>
    %c91 = arith.constant 91 : index
    %c0_19 = arith.constant 0 : index
    %32 = vector.load %arg11[%c91, %c0_19] : memref<128x128xf32, #tpu.memory_space<vmem>>, vector<32x128xf32>
    %33 = vector.broadcast %31 : vector<32x1xf32> to vector<32x128xf32>
    %34 = arith.mulf %32, %33 : vector<32x128xf32>
    %35 = arith.truncf %34 : vector<32x128xf32> to vector<32x128xbf16>
    %c60 = arith.constant 60 : index
    %c0_20 = arith.constant 0 : index
    %36 = vector.load %arg11[%c60, %c0_20] : memref<128x128xf32, #tpu.memory_space<vmem>>, vector<32x128xf32>
    %37 = vector.broadcast %29 : vector<32x1xf32> to vector<32x128xf32>
    %38 = arith.mulf %36, %37 : vector<32x128xf32>
    %39 = arith.truncf %38 : vector<32x128xf32> to vector<32x128xbf16>
    %c92 = arith.constant 92 : index
    %c0_21 = arith.constant 0 : index
    %40 = vector.load %arg11[%c92, %c0_21] : memref<128x128xf32, #tpu.memory_space<vmem>>, vector<32x128xf32>
    %41 = vector.broadcast %29 : vector<32x1xf32> to vector<32x128xf32>
    %42 = arith.mulf %40, %41 : vector<32x128xf32>
    %43 = arith.truncf %42 : vector<32x128xf32> to vector<32x128xbf16>
    %c31 = arith.constant 31 : index
    %c0_22 = arith.constant 0 : index
    %44 = vector.load %arg11[%c31, %c0_22] : memref<128x128xf32, #tpu.memory_space<vmem>>, vector<32x128xf32>
    %45 = vector.broadcast %30 : vector<32x1xf32> to vector<32x128xf32>
    %46 = arith.mulf %44, %45 : vector<32x128xf32>
    %47 = arith.truncf %46 : vector<32x128xf32> to vector<32x128xbf16>
    %c0_23 = arith.constant 0 : index
    %c0_24 = arith.constant 0 : index
    %48 = vector.load %arg11[%c0_23, %c0_24] : memref<128x128xf32, #tpu.memory_space<vmem>>, vector<32x128xf32>
    %49 = arith.truncf %48 : vector<32x128xf32> to vector<32x128xbf16>
    %c32 = arith.constant 32 : index
    %c0_25 = arith.constant 0 : index
    %50 = vector.load %arg11[%c32, %c0_25] : memref<128x128xf32, #tpu.memory_space<vmem>>, vector<32x128xf32>
    %51 = arith.truncf %50 : vector<32x128xf32> to vector<32x128xbf16>
    %c95 = arith.constant 95 : index
    %c0_26 = arith.constant 0 : index
    %52 = vector.load %arg11[%c95, %c0_26] : memref<128x128xf32, #tpu.memory_space<vmem>>, vector<32x128xf32>
    %53 = vector.broadcast %30 : vector<32x1xf32> to vector<32x128xf32>
    %54 = arith.mulf %52, %53 : vector<32x128xf32>
    %55 = arith.truncf %54 : vector<32x128xf32> to vector<32x128xbf16>
    %c64 = arith.constant 64 : index
    %c0_27 = arith.constant 0 : index
    %56 = vector.load %arg11[%c64, %c0_27] : memref<128x128xf32, #tpu.memory_space<vmem>>, vector<32x128xf32>
    %57 = arith.truncf %56 : vector<32x128xf32> to vector<32x128xbf16>
    %c96 = arith.constant 96 : index
    %c0_28 = arith.constant 0 : index
    %58 = vector.load %arg11[%c96, %c0_28] : memref<128x128xf32, #tpu.memory_space<vmem>>, vector<32x128xf32>
    %59 = arith.truncf %58 : vector<32x128xf32> to vector<32x128xbf16>
    %60 = tpu.concatenate %35, %39, %43, %47, %49, %51, %55, %57, %59 in 1 : vector<32x128xbf16>, vector<32x128xbf16>, vector<32x128xbf16>, vector<32x128xbf16>, vector<32x128xbf16>, vector<32x128xbf16>, vector<32x128xbf16>, vector<32x128xbf16>, vector<32x128xbf16> -> vector<32x1152xbf16>
    %c0_29 = arith.constant 0 : index
    %c0_30 = arith.constant 0 : index
    %61 = vector.load %arg5[%c0_29, %c0_30] : memref<1152x8xbf16, #tpu.memory_space<vmem>>, vector<1152x8xbf16>
    %cst_31 = arith.constant dense<0.000000e+00> : vector<32x8xf32>
    %62 = tpu.matmul %60, %61, %cst_31 {dimension_numbers = #tpu.dot_dimension_numbers<[1], [0], [0], [1], [0, 0, 1, 1], [], []>} : vector<32x1152xbf16>, vector<1152x8xbf16>, vector<32x8xf32> -> vector<32x8xf32>
    %c0_32 = arith.constant 0 : index
    %c0_33 = arith.constant 0 : index
    %63 = vector.load %arg6[%c0_32, %c0_33] : memref<1x8xf32, #tpu.memory_space<vmem>>, vector<1x8xf32>
    %c0_34 = arith.constant 0 : index
    %c0_35 = arith.constant 0 : index
    %64 = vector.load %arg7[%c0_34, %c0_35] : memref<1x8xf32, #tpu.memory_space<vmem>>, vector<1x8xf32>
    %cst_36 = arith.constant dense<0.000000e+00> : vector<8xf32>
    %65 = vector.multi_reduction <add>, %62, %cst_36 [0] : vector<32x8xf32> to vector<8xf32>
    %66 = vector.shape_cast %65 : vector<8xf32> to vector<1x8xf32>
    %cst_37 = arith.constant 3.200000e+01 : f32
    %67 = vector.broadcast %cst_37 : f32 to vector<1x8xf32>
    %68 = arith.divf %66, %67 : vector<1x8xf32>
    %69 = vector.broadcast %68 : vector<1x8xf32> to vector<32x8xf32>
    %70 = arith.subf %62, %69 : vector<32x8xf32>
    %71 = arith.mulf %70, %70 : vector<32x8xf32>
    %cst_38 = arith.constant dense<0.000000e+00> : vector<8xf32>
    %72 = vector.multi_reduction <add>, %71, %cst_38 [0] : vector<32x8xf32> to vector<8xf32>
    %73 = vector.shape_cast %72 : vector<8xf32> to vector<1x8xf32>
    %cst_39 = arith.constant 3.200000e+01 : f32
    %74 = vector.broadcast %cst_39 : f32 to vector<1x8xf32>
    %75 = arith.divf %73, %74 : vector<1x8xf32>
    %cst_40 = arith.constant 9.99999974E-6 : f32
    %76 = vector.broadcast %cst_40 : f32 to vector<1x8xf32>
    %77 = arith.addf %75, %76 : vector<1x8xf32>
    %78 = math.rsqrt %77 : vector<1x8xf32>
    %79 = arith.mulf %63, %78 : vector<1x8xf32>
    %80 = arith.mulf %68, %79 : vector<1x8xf32>
    %81 = arith.subf %64, %80 : vector<1x8xf32>
    %82 = vector.broadcast %79 : vector<1x8xf32> to vector<32x8xf32>
    %83 = arith.mulf %62, %82 : vector<32x8xf32>
    %84 = vector.broadcast %81 : vector<1x8xf32> to vector<32x8xf32>
    %85 = arith.addf %83, %84 : vector<32x8xf32>
    %cst_41 = arith.constant 0.000000e+00 : f32
    %86 = vector.broadcast %cst_41 : f32 to vector<32x8xf32>
    %87 = arith.maximumf %85, %86 : vector<32x8xf32>
    %c0_42 = arith.constant 0 : index
    %c0_43 = arith.constant 0 : index
    %88 = vector.load %arg10[%c0_42, %c0_43] : memref<32x8xf32, #tpu.memory_space<vmem>>, vector<32x8xf32>
    tpu.vector_store %arg10[%c0_42, %c0_43], %87 {strides = array<i32>} : memref<32x8xf32, #tpu.memory_space<vmem>>, vector<32x8xf32>,
    return
  }
  func.func @transform_0(%arg0: i32) -> (i32, i32) {
    %c0_i32 = arith.constant 0 : i32
    %c0_i32_0 = arith.constant 0 : i32
    %c0_i32_1 = arith.constant 0 : i32
    return %c0_i32, %c0_i32_0 : i32, i32
  }
  func.func @transform_1(%arg0: i32) -> (i32, i32) {
    %c0_i32 = arith.constant 0 : i32
    %c0_i32_0 = arith.constant 0 : i32
    %c0_i32_1 = arith.constant 0 : i32
    return %c0_i32, %c0_i32_0 : i32, i32
  }
  func.func @transform_2(%arg0: i32) -> (i32, i32) {
    %c0_i32 = arith.constant 0 : i32
    %c0_i32_0 = arith.constant 0 : i32
    %c0_i32_1 = arith.constant 0 : i32
    return %c0_i32, %c0_i32_0 : i32, i32
  }
  func.func @transform_3(%arg0: i32) -> (i32, i32) {
    %c0_i32 = arith.constant 0 : i32
    %c0_i32_0 = arith.constant 0 : i32
    %c0_i32_1 = arith.constant 0 : i32
    return %c0_i32, %c0_i32_0 : i32, i32
  }
  func.func @transform_4(%arg0: i32) -> (i32, i32) {
    %c0_i32 = arith.constant 0 : i32
    %c0_i32_0 = arith.constant 0 : i32
    %c0_i32_1 = arith.constant 0 : i32
    return %c0_i32, %c0_i32_0 : i32, i32
  }
  func.func @transform_5(%arg0: i32) -> (i32, i32) {
    %c0_i32 = arith.constant 0 : i32
    %c0_i32_0 = arith.constant 0 : i32
    %c0_i32_1 = arith.constant 0 : i32
    return %c0_i32, %c0_i32_0 : i32, i32
  }
  func.func @transform_6(%arg0: i32) -> (i32, i32) {
    %c0_i32 = arith.constant 0 : i32
    %c0_i32_0 = arith.constant 0 : i32
    %c0_i32_1 = arith.constant 0 : i32
    return %c0_i32, %c0_i32_0 : i32, i32
  }
  func.func @transform_7(%arg0: i32) -> (i32, i32) {
    %c0_i32 = arith.constant 0 : i32
    %c0_i32_0 = arith.constant 0 : i32
    %c0_i32_1 = arith.constant 0 : i32
    return %c0_i32, %c0_i32_0 : i32, i32
  }
  func.func @transform_8(%arg0: i32) -> (i32, i32) {
    %c0_i32 = arith.constant 0 : i32
    %c0_i32_0 = arith.constant 0 : i32
    %c0_i32_1 = arith.constant 0 : i32
    return %c0_i32, %c0_i32_0 : i32, i32
  }
  func.func @transform_9(%arg0: i32) -> (i32, i32) {
    %c0_i32 = arith.constant 0 : i32
    %c0_i32_0 = arith.constant 0 : i32
    %c0_i32_1 = arith.constant 0 : i32
    return %c0_i32, %c0_i32_0 : i32, i32
  }
}

</mosaic_0001>

<bundles_post_ra>
// kernel: tpu_custom_call.1
= control target key start
LH: loop header
LB: loop body
LE: loop exit
PB: predicated region body
PF: predicated region fallthrough
CT: control target
= control target key end

     0   :  { %vm134_vm0 = vcmask 1041408   ;;  %vm109_vm1 = vcmask 293888   ;;  %v1893_v21 = vmov 0   ;;  %v1894_v49 = vmov 128.0   ;;  %s2517_s1 = inlined_call_operand.vmem [shape: bf16[36,128], index: 1, kind: input, shape index: {}]   ;;  %s2518_s0 = inlined_call_operand.vmem [shape: bf16[128,36], index: 0, kind: input, shape index: {}]   ;;  %s2519_s7 = inlined_call_operand.vmem [shape: f32[32,1], index: 7, kind: input, shape index: {}]   ;;  %s2520_s8 = inlined_call_operand.vmem [shape: f32[32,1], index: 8, kind: input, shape index: {}]   ;;  %s2521_s4 = inlined_call_operand.vmem [shape: bf16[1152,8], index: 4, kind: input, shape index: {}]   ;;  %s2522_s2 = inlined_call_operand.vmem [shape: f32[1,128], index: 2, kind: input, shape index: {}]   ;;  %s2523_s3 = inlined_call_operand.vmem [shape: f32[1,128], index: 3, kind: input, shape index: {}]   ;;  %s2524_s5 = inlined_call_operand.vmem [shape: f32[1,8], index: 5, kind: input, shape index: {}]   ;;  %s2525_s6 = inlined_call_operand.vmem [shape: f32[1,8], index: 6, kind: input, shape index: {}]   ;;  %s2526_s9 = inlined_call_operand.vmem [shape: f32[32,8], index: 9, kind: output, shape index: {}]  }
   0x1   :  { %v53_v0 = vld [vmem:[%s2517_s1 + $0x10] sm:$0x3]  ;;  %v1806_v4 = vld [vmem:[%s2517_s1 + $0x8] sm:$0xff]  ;;  %v1805_v5 = vld [vmem:[%s2517_s1] sm:$0xff]  ;;  %1882 = vset.pattern.permute.xlu0 %v1893_v21  ;;  %1883 = vset.pattern.permute.xlu1 %v1893_v21  ;;  %1885 = vrcp.f32 %v1894_v49  ;;  %vm1377_vm6 = vcmask 64512  }
   0x2   :  { %v103_v1 = vunpack.c.l.b16 %v53_v0  ;;  %v1797_v6 = vld [vmem:[%s2518_s0] sm:$0xff]  ;;  %v1798_v7 = vld [vmem:[%s2518_s0 + $0x8] sm:$0xff]  ;;  %v1799_v8 = vld [vmem:[%s2518_s0 + $0x10] sm:$0xff]  ;;  %1884 = vset.pattern.permute.xlu2 %v1893_v21 }
   0x3   :  { %v1800_v9 = vld [vmem:[%s2518_s0 + $0x18] sm:$0xff]  ;;  %v1801_v10 = vld [vmem:[%s2518_s0 + $0x20] sm:$0xff]  ;;  %v1802_v11 = vld [vmem:[%s2518_s0 + $0x28] sm:$0xff] }
   0x4   :  { %v106_v2 = vpack.c.b16 %v103_v1, %v103_v1  ;;  %v1803_v12 = vld [vmem:[%s2518_s0 + $0x30] sm:$0xff]  ;;  %v1804_v13 = vld [vmem:[%s2518_s0 + $0x38] sm:$0xff]  ;;  %v356_v20 = vld [vmem:[%s2519_s7] sm:$0xff] }
   0x5   :  { %406 = vperm.xlu0 %1882, %v356_v20   ;;  %v360_v22 = vld [vmem:[%s2520_s8] sm:$0xff]  ;;  %v357_v25 = vld [vmem:[%s2519_s7 + $0x8] sm:$0xff]  ;;  %v358_v29 = vld [vmem:[%s2519_s7 + $0x10] sm:$0xff] }
   0x6   :  { %v136_v3 = vsel %vm134_vm0, %v106_v2, 0  ;;  %v364_v24 = vmul.f32 %v360_v22, %v356_v20  ;;  %v361_v26 = vld [vmem:[%s2520_s8 + $0x8] sm:$0xff]  ;;  %v362_v30 = vld [vmem:[%s2520_s8 + $0x10] sm:$0xff]  ;;  %416 = vperm.xlu2 %1884, %v358_v29   ;;  %v359_v32 = vld [vmem:[%s2519_s7 + $0x18] sm:$0xff] }
   0x7   :  { %143 = vmatpush.bf16.msra.mxu0 %v136_v3  ;;  %v365_v27 = vmul.f32 %v361_v26, %v357_v25  ;;  %v366_v31 = vmul.f32 %v362_v30, %v358_v29  ;;  %v363_v33 = vld [vmem:[%s2520_s8 + $0x18] sm:$0xff]  ;;  %v1886_v53 = vpop.eup %1885 }
   0x8   :  { %374 = vperm.xlu1 %1883, %v364_v24   ;;  %v367_v35 = vmul.f32 %v363_v33, %v359_v32  ;;  %v211_v56 = vmul.f32 128.0, %v1886_v53  ;;  %vm215_vm2 = vweird.f32 %v1886_v53 }
   0xa   :  { %v212_v60 = vsub.f32 1.0, %v211_v56 }
   0xb   :  { %144 = vmatpush.bf16.msra.mxu0 %v1806_v4 }
   0xc   :  { %v213_v63 = vmul.f32 %v1886_v53, %v212_v60 }
   0xd   :  { %411 = vperm.xlu0 %1882, %v357_v25  }
   0xe   :  { %421 = vperm.xlu2 %1884, %v359_v32   ;;  %v214_v2 = vadd.f32 %v1886_v53, %v213_v63 }
   0xf   :  { %145 = vmatpush.bf16.msra.mxu0 %v1805_v5 }
  0x10   :  { %379 = vperm.xlu1 %1883, %v365_v27   ;;  %v2051_v5 = vsel %vm215_vm2, %v1886_v53, %v214_v2 }
  0x12   :  { %1501 = vmatmul.msk.bf16.vlgmr.msra.gmra.mxu0 %vm109_vm1, %v1797_v6 }
  0x15   :  { %384 = vperm.xlu0 %1882, %v366_v31  }
  0x16   :  { %450 = vperm.xlu2 %1884, %v360_v22  }
  0x18   :  { %389 = vperm.xlu1 %1883, %v367_v35  }
  0x1d   :  { %455 = vperm.xlu0 %1882, %v361_v26  }
  0x1e   :  { %465 = vperm.xlu2 %1884, %v363_v33  }
  0x20   :  { %460 = vperm.xlu1 %1883, %v362_v30  }
  0x22   :  { %1502 = vmatmul.msk.bf16.gmra.mxu0 %vm109_vm1, %v1798_v7 }
  0x32   :  { %1503 = vmatmul.msk.bf16.gmra.mxu0 %vm109_vm1, %v1799_v8 }
  0x42   :  { %1504 = vmatmul.msk.bf16.gmra.mxu0 %vm109_vm1, %v1800_v9 }
  0x52   :  { %1505 = vmatmul.msk.bf16.gmra.mxu0 %vm109_vm1, %v1801_v10 }
  0x62   :  { %1506 = vmatmul.msk.bf16.gmra.mxu0 %vm109_vm1, %v1802_v11 }
  0x72   :  { %1507 = vmatmul.msk.bf16.gmra.mxu0 %vm109_vm1, %v1803_v12 }
  0x82   :  { %1508 = vmatmul.msk.bf16.gmra.mxu0 %vm109_vm1, %v1804_v13 }
  0x8f   :  { %v1979_v14 = vpop.f32.mrf.mxu0 }
  0x97   :  { %v1981_v15 = vpop.f32.mrf.mxu0 }
  0x98   :  { %v189_v39 = vadd.f32 %v1981_v15, %v1979_v14 }
  0x9f   :  { %v1983_v16 = vpop.f32.mrf.mxu0 }
  0xa0   :  { %v190_v40 = vadd.f32 %v189_v39, %v1983_v16 }
  0xa7   :  { %v1985_v17 = vpop.f32.mrf.mxu0 }
  0xa8   :  { %v191_v42 = vadd.f32 %v190_v40, %v1985_v17 }
  0xaf   :  { %v1987_v18 = vpop.f32.mrf.mxu0 }
  0xb0   :  { %v192_v43 = vadd.f32 %v191_v42, %v1987_v18 }
  0xb7   :  { %v1989_v19 = vpop.f32.mrf.mxu0 }
  0xb8   :  { %v193_v44 = vadd.f32 %v192_v43, %v1989_v19 }
  0xbf   :  { %v1997_v23 = vpop.f32.mrf.mxu0 }
  0xc0   :  { %v194_v45 = vadd.f32 %v193_v44, %v1997_v23 }
  0xc7   :  { %v2005_v28 = vpop.f32.mrf.mxu0 }
  0xc8   :  { %v195_v47 = vadd.f32 %v194_v45, %v2005_v28 }
  0xcf   :  { %v2019_v34 = vpop.f32.mrf.mxu0 }
  0xd0   :  { %v196_v48 = vadd.f32 %v195_v47, %v2019_v34 }
  0xd7   :  { %v2021_v36 = vpop.f32.mrf.mxu0 }
  0xd8   :  { %v197_v50 = vadd.f32 %v196_v48, %v2021_v36 }
  0xdf   :  { %v2023_v37 = vpop.f32.mrf.mxu0 }
  0xe0   :  { %v198_v51 = vadd.f32 %v197_v50, %v2023_v37 }
  0xe7   :  { %v2025_v38 = vpop.f32.mrf.mxu0 }
  0xe8   :  { %v199_v54 = vadd.f32 %v198_v51, %v2025_v38 }
  0xef   :  { %v2030_v41 = vpop.f32.mrf.mxu0 }
  0xf0   :  { %v200_v55 = vadd.f32 %v199_v54, %v2030_v41 }
  0xf7   :  { %v2036_v46 = vpop.f32.mrf.mxu0 }
  0xf8   :  { %v201_v57 = vadd.f32 %v200_v55, %v2036_v46 }
  0xff   :  { %v2042_v52 = vpop.f32.mrf.mxu0 }
 0x100   :  { %v202_v58 = vadd.f32 %v201_v57, %v2042_v52 }
 0x107   :  { %v2048_v59 = vpop.f32.mrf.mxu0 }
 0x108   :  { %v203_v61 = vadd.f32 %v202_v58, %v2048_v59 }
 0x10a   :  { %v204_v62 = vrot.slane %v203_v61, 4 }
 0x10c   :  { %v205_v0 = vadd.f32 %v204_v62, %v203_v61 }
 0x10e   :  { %v206_v1 = vrot.slane %v205_v0, 2 }
 0x110   :  { %v207_v3 = vadd.f32 %v206_v1, %v205_v0 }
 0x112   :  { %v208_v4 = vrot.slane %v207_v3, 1 }
 0x114   :  { %v209_v6 = vadd.f32 %v208_v4, %v207_v3 }
 0x116   :  { %v2054_v7 = vmul.f32 %v2051_v5, %v209_v6 }
 0x118   :  { %v218_v8 = vsub.f32 %v1979_v14, %v2054_v7  ;;  %v219_v9 = vsub.f32 %v1981_v15, %v2054_v7  ;;  %v220_v10 = vsub.f32 %v1983_v16, %v2054_v7  ;;  %v221_v13 = vsub.f32 %v1985_v17, %v2054_v7 }
 0x119   :  { %v222_v20 = vsub.f32 %v1987_v18, %v2054_v7  ;;  %v223_v24 = vsub.f32 %v1989_v19, %v2054_v7  ;;  %v224_v27 = vsub.f32 %v1997_v23, %v2054_v7  ;;  %v225_v31 = vsub.f32 %v2005_v28, %v2054_v7 }
 0x11a   :  { %v234_v11 = vmul.f32 %v218_v8, %v218_v8  ;;  %v235_v12 = vmul.f32 %v219_v9, %v219_v9  ;;  %v236_v21 = vmul.f32 %v220_v10, %v220_v10  ;;  %v237_v25 = vmul.f32 %v221_v13, %v221_v13  ;;  %v1822_v13 = vld [vmem:[%s2521_s4 + $0x78] sm:$0xff] }
 0x11b   :  { %v238_v29 = vmul.f32 %v222_v20, %v222_v20  ;;  %v239_v32 = vmul.f32 %v223_v24, %v223_v24  ;;  %v226_v35 = vsub.f32 %v2019_v34, %v2054_v7  ;;  %v240_v39 = vmul.f32 %v224_v27, %v224_v27  ;;  %v1830_v20 = vld [vmem:[%s2521_s4 + $0xb8] sm:$0xff]  ;;  %1223 = vmatpush.bf16.msra.mxu2 %v1822_v13  ;;  %v1813_v24 = vld [vmem:[%s2521_s4 + $0x30] sm:$0xff] }
 0x11c   :  { %v250_v22 = vadd.f32 %v235_v12, %v234_v11  ;;  %v227_v42 = vsub.f32 %v2021_v36, %v2054_v7  ;;  %v241_v43 = vmul.f32 %v225_v31, %v225_v31  ;;  %v228_v45 = vsub.f32 %v2023_v37, %v2054_v7  ;;  %v1814_v12 = vld [vmem:[%s2521_s4 + $0x38] sm:$0xff]  ;;  %1242 = vmatpush.bf16.msra.mxu3 %v1830_v20  ;;  %v1812_v31 = vld [vmem:[%s2521_s4 + $0x28] sm:$0xff] }
 0x11d   :  { %v242_v47 = vmul.f32 %v226_v35, %v226_v35  ;;  %v229_v49 = vsub.f32 %v2025_v38, %v2054_v7  ;;  %v230_v53 = vsub.f32 %v2030_v41, %v2054_v7  ;;  %v231_v56 = vsub.f32 %v2036_v46, %v2054_v7  ;;  %1204 = vmatpush.bf16.msra.mxu1 %v1814_v12  ;;  %v1819_v35 = vld [vmem:[%s2521_s4 + $0x60] sm:$0xff] }
 0x11e   :  { %v251_v26 = vadd.f32 %v250_v22, %v236_v21  ;;  %v243_v50 = vmul.f32 %v227_v42, %v227_v42  ;;  %v244_v54 = vmul.f32 %v228_v45, %v228_v45  ;;  %v232_v60 = vsub.f32 %v2042_v52, %v2054_v7  ;;  %v1818_v45 = vld [vmem:[%s2521_s4 + $0x58] sm:$0xff] }
 0x11f   :  { %v245_v57 = vmul.f32 %v229_v49, %v229_v49  ;;  %v246_v61 = vmul.f32 %v230_v53, %v230_v53  ;;  %v233_v63 = vsub.f32 %v2048_v59, %v2054_v7  ;;  %v247_v0 = vmul.f32 %v231_v56, %v231_v56  ;;  %v1825_v56 = vld [vmem:[%s2521_s4 + $0x90] sm:$0xff] }
 0x120   :  { %v252_v30 = vadd.f32 %v251_v26, %v237_v25  ;;  %v248_v2 = vmul.f32 %v232_v60, %v232_v60  ;;  %v1821_v25 = vld [vmem:[%s2521_s4 + $0x70] sm:$0xff] }
 0x121   :  { %v249_v4 = vmul.f32 %v233_v63, %v233_v63  ;;  %v1829_v26 = vld [vmem:[%s2521_s4 + $0xb0] sm:$0xff]  ;;  %1205 = vmatpush.bf16.msra.mxu1 %v1813_v24  ;;  %1224 = vmatpush.bf16.msra.mxu2 %v1821_v25  ;;  %v1808_v63 = vld [vmem:[%s2521_s4 + $0x8] sm:$0xff]  ;;  %v1854_v24 = vld [vmem:[%s2521_s4 + $0x178] sm:$0xff] }
 0x122   :  { %v253_v33 = vadd.f32 %v252_v30, %v238_v29  ;;  %1243 = vmatpush.bf16.msra.mxu3 %v1829_v26 }
 0x124   :  { %v254_v40 = vadd.f32 %v253_v33, %v239_v32  ;;  %v1820_v32 = vld [vmem:[%s2521_s4 + $0x68] sm:$0xff] }
 0x125   :  { %v1828_v33 = vld [vmem:[%s2521_s4 + $0xa8] sm:$0xff]  ;;  %1206 = vmatpush.bf16.msra.mxu1 %v1812_v31  ;;  %1225 = vmatpush.bf16.msra.mxu2 %v1820_v32  ;;  %v1845_v31 = vld [vmem:[%s2521_s4 + $0x130] sm:$0xff] }
 0x126   :  { %v255_v44 = vadd.f32 %v254_v40, %v240_v39  ;;  %1244 = vmatpush.bf16.msra.mxu3 %v1828_v33  ;;  %v1827_v39 = vld [vmem:[%s2521_s4 + $0xa0] sm:$0xff] }
 0x128   :  { %v256_v48 = vadd.f32 %v255_v44, %v241_v43  ;;  %v1810_v44 = vld [vmem:[%s2521_s4 + $0x18] sm:$0xff] }
 0x129   :  { %1226 = vmatpush.bf16.msra.mxu2 %v1819_v35  ;;  %v1837_v35 = vld [vmem:[%s2521_s4 + $0xf0] sm:$0xff] }
 0x12a   :  { %v257_v51 = vadd.f32 %v256_v48, %v242_v47  ;;  %1245 = vmatpush.bf16.msra.mxu3 %v1827_v39  ;;  %v1826_v47 = vld [vmem:[%s2521_s4 + $0x98] sm:$0xff] }
 0x12c   :  { %v258_v55 = vadd.f32 %v257_v51, %v243_v50  ;;  %v187_v50 = vld [vmem:[%s2522_s2] sm:$0x1] }
 0x12d   :  { %1227 = vmatpush.bf16.msra.mxu2 %v1818_v45  ;;  %v407_v45 = vpop.permute.xlu0 %406 }
 0x12e   :  { %v259_v58 = vadd.f32 %v258_v55, %v244_v54  ;;  %1246 = vmatpush.bf16.msra.mxu3 %v1826_v47  ;;  %v1809_v54 = vld [vmem:[%s2521_s4 + $0x10] sm:$0xff] }
 0x12f   :  { %v1817_v55 = vld [vmem:[%s2521_s4 + $0x50] sm:$0xff] }
 0x130   :  { %v260_v62 = vadd.f32 %v259_v58, %v245_v57  ;;  %v188_v58 = vld [vmem:[%s2523_s3] sm:$0x1] }
 0x131   :  { %1228 = vmatpush.bf16.msra.mxu2 %v1817_v55 }
 0x132   :  { %v261_v1 = vadd.f32 %v260_v62, %v246_v61  ;;  %1247 = vmatpush.bf16.msra.mxu3 %v1825_v56 }
 0x134   :  { %v262_v3 = vadd.f32 %v261_v1, %v247_v0  ;;  %v1816_v0 = vld [vmem:[%s2521_s4 + $0x48] sm:$0xff] }
 0x135   :  { %v1824_v1 = vld [vmem:[%s2521_s4 + $0x88] sm:$0xff]  ;;  %1229 = vmatpush.bf16.msra.mxu2 %v1816_v0 }
 0x136   :  { %v263_v6 = vadd.f32 %v262_v3, %v248_v2  ;;  %1248 = vmatpush.bf16.msra.mxu3 %v1824_v1  ;;  %v1851_v1 = vld [vmem:[%s2521_s4 + $0x160] sm:$0xff] }
 0x138   :  { %v264_v8 = vadd.f32 %v263_v6, %v249_v4 }
 0x13a   :  { %v265_v9 = vrot.slane %v264_v8, 4 }
 0x13c   :  { %v266_v10 = vadd.f32 %v265_v9, %v264_v8 }
 0x13e   :  { %v267_v11 = vrot.slane %v266_v10, 2 }
 0x140   :  { %v268_v21 = vadd.f32 %v267_v11, %v266_v10  ;;  %v1807_v11 = vld [vmem:[%s2521_s4] sm:$0xff] }
 0x142   :  { %v269_v22 = vrot.slane %v268_v21, 1 }
 0x144   :  { %v270_v27 = vadd.f32 %v269_v22, %v268_v21  ;;  %v1846_v21 = vld [vmem:[%s2521_s4 + $0x138] sm:$0xff] }
 0x145   :  { %v1838_v22 = vld [vmem:[%s2521_s4 + $0xf8] sm:$0xff] }
 0x146   :  { %v271_v29 = vmul.f32 %v270_v27, %v2051_v5  ;;  %v1811_v5 = vld [vmem:[%s2521_s4 + $0x20] sm:$0xff] }
 0x147   :  { %1207 = vmatpush.bf16.msra.mxu1 %v1811_v5 }
 0x148   :  { %v272_v30 = vadd.f32 1e-05, %v271_v29 }
 0x14a   :  { %1887 = vrsqrt.f32 %v272_v30  ;;  %vm279_vm4 = vweird.f32 %v272_v30 }
 0x14b   :  { %1208 = vmatpush.bf16.msra.mxu1 %v1810_v44 }
 0x14f   :  { %1209 = vmatpush.bf16.msra.mxu1 %v1809_v54 }
 0x150   :  { %v1888_v40 = vpop.eup %1887 }
 0x151   :  { %v274_v42 = vmul.f32 %v1888_v40, %v272_v30  ;;  %vm280_vm3 = vweird.f32 %v1888_v40 }
 0x152   :  { %vm281_vm5 = vmor %vm279_vm4, %vm280_vm3 }
 0x153   :  { %v275_v43 = vmul.f32 %v1888_v40, %v274_v42  ;;  %1210 = vmatpush.bf16.msra.mxu1 %v1808_v63  ;;  %v1853_v42 = vld [vmem:[%s2521_s4 + $0x170] sm:$0xff] }
 0x155   :  { %v276_v48 = vmul.f32 0.5, %v275_v43 }
 0x157   :  { %v277_v49 = vsub.f32 1.5, %v276_v48  ;;  %1211 = vmatpush.bf16.msra.mxu1 %v1807_v11  ;;  %v1844_v48 = vld [vmem:[%s2521_s4 + $0x128] sm:$0xff]  ;;  %v1842_v11 = vld [vmem:[%s2521_s4 + $0x118] sm:$0xff] }
 0x159   :  { %v278_v51 = vmul.f32 %v1888_v40, %v277_v49 }
 0x15b   :  { %v282_v53 = vsel %vm281_vm5, %v1888_v40, %v278_v51  ;;  %1261 = vmatpush.bf16.msrb.mxu1 %v1838_v22 }
 0x15c   :  { %v283_v57 = vmul.f32 %v282_v53, %v187_v50  ;;  %v375_v50 = vpop.permute.xlu1 %374  ;;  %v1836_v53 = vld [vmem:[%s2521_s4 + $0xe8] sm:$0xff] }
 0x15e   :  { %v284_v60 = vmul.f32 %v283_v57, %v2054_v7  ;;  %v2150_v61 = vperm.slane %v283_v57, 0 }
 0x15f   :  { %1262 = vmatpush.bf16.msrb.mxu1 %v1837_v35  ;;  %v417_v35 = vpop.permute.xlu2 %416 }
 0x160   :  { %v285_v62 = vsub.f32 %v188_v58, %v284_v60  ;;  %v304_v2 = vmul.f32 %v2150_v61, %v2048_v59  ;;  %v296_v3 = vmul.f32 %v2150_v61, %v2005_v28  ;;  %v297_v4 = vmul.f32 %v2150_v61, %v2019_v34 }
 0x161   :  { %v300_v6 = vmul.f32 %v2150_v61, %v2025_v38  ;;  %v301_v8 = vmul.f32 %v2150_v61, %v2030_v41  ;;  %v298_v9 = vmul.f32 %v2150_v61, %v2021_v36  ;;  %v299_v59 = vmul.f32 %v2150_v61, %v2023_v37  ;;  %v1815_v36 = vld [vmem:[%s2521_s4 + $0x40] sm:$0xff] }
 0x162   :  { %v2163_v7 = vperm.slane %v285_v62, 0  ;;  %v1823_v37 = vld [vmem:[%s2521_s4 + $0x80] sm:$0xff]  ;;  %v302_v12 = vmul.f32 %v2150_v61, %v2036_v46  ;;  %v303_v13 = vmul.f32 %v2150_v61, %v2042_v52  ;;  %1230 = vmatpush.bf16.msra.mxu2 %v1815_v36  ;;  %v292_v30 = vmul.f32 %v2150_v61, %v1985_v17 }
 0x163   :  { %1249 = vmatpush.bf16.msra.mxu3 %v1823_v37  ;;  %v293_v5 = vmul.f32 %v2150_v61, %v1987_v18  ;;  %v294_v40 = vmul.f32 %v2150_v61, %v1989_v19  ;;  %v295_v44 = vmul.f32 %v2150_v61, %v1997_v23  ;;  %v289_v49 = vmul.f32 %v2150_v61, %v1979_v14  ;;  %v1852_v14 = vld [vmem:[%s2521_s4 + $0x168] sm:$0xff]  ;;  %v1843_v62 = vld [vmem:[%s2521_s4 + $0x120] sm:$0xff] }
 0x164   :  { %v323_v28 = vadd.f32 %v2163_v7, %v304_v2  ;;  %v315_v10 = vadd.f32 %v2163_v7, %v296_v3  ;;  %v316_v34 = vadd.f32 %v2163_v7, %v297_v4  ;;  %v319_v38 = vadd.f32 %v2163_v7, %v300_v6  ;;  %1263 = vmatpush.bf16.msrb.mxu1 %v1836_v53 }
 0x165   :  { %v320_v41 = vadd.f32 %v2163_v7, %v301_v8  ;;  %v317_v20 = vadd.f32 %v2163_v7, %v298_v9  ;;  %v318_v52 = vadd.f32 %v2163_v7, %v299_v59  ;;  %v321_v29 = vadd.f32 %v2163_v7, %v302_v12 }
 0x166   :  { %v339_v25 = vmax.f32 %v323_v28, 0.0  ;;  %v2205_v26 = vmax.f32 %v315_v10, 0.0  ;;  %v2207_v46 = vmax.f32 %v316_v34, 0.0  ;;  %v2210_v27 = vmax.f32 %v319_v38, 0.0  ;;  %1280 = vmatpush.bf16.msrb.mxu2 %v1846_v21  ;;  %v412_v38 = vpop.permute.xlu0 %411 }
 0x167   :  { %v2218_v32 = vmax.f32 %v320_v41, 0.0  ;;  %v322_v33 = vadd.f32 %v2163_v7, %v303_v13  ;;  %v333_v17 = vmax.f32 %v317_v20, 0.0  ;;  %v311_v39 = vadd.f32 %v2163_v7, %v292_v30  ;;  %1299 = vmatpush.bf16.msrb.mxu3 %v1854_v24  ;;  %v380_v13 = vpop.permute.xlu1 %379 }
 0x168   :  { %355 = vst [vmem:[#allocation2 + $0x78] sm:$0xff] %v339_v25  ;;  %v2234_v18 = vmax.f32 %v318_v52, 0.0  ;;  %v312_v43 = vadd.f32 %v2163_v7, %v293_v5  ;;  %v2240_v47 = vmax.f32 %v321_v29, 0.0  ;;  %v313_v19 = vadd.f32 %v2163_v7, %v294_v40  ;;  %v1834_v52 = vld [vmem:[%s2521_s4 + $0xd8] sm:$0xff]  ;;  %v1849_v40 = vld [vmem:[%s2521_s4 + $0x150] sm:$0xff] }
 0x169   :  { %347 = vst [vmem:[#allocation2 + $0x38] sm:$0xff] %v2205_v26  ;;  %v2249_v51 = vmax.f32 %v322_v33, 0.0  ;;  %v314_v23 = vadd.f32 %v2163_v7, %v295_v44  ;;  %v290_v54 = vmul.f32 %v2150_v61, %v1981_v15  ;;  %v2257_v55 = vmax.f32 %v311_v39, 0.0  ;;  %v1850_v29 = vld [vmem:[%s2521_s4 + $0x158] sm:$0xff]  ;;  %v1841_v33 = vld [vmem:[%s2521_s4 + $0x110] sm:$0xff] }
 0x16a   :  { %348 = vst [vmem:[#allocation2 + $0x40] sm:$0xff] %v2207_v46  ;;  %1281 = vmatpush.bf16.msrb.mxu2 %v1845_v31  ;;  %v2263_v56 = vadd.f32 %v2163_v7, %v289_v49  ;;  %v2266_v57 = vmax.f32 %v312_v43, 0.0  ;;  %v291_v15 = vmul.f32 %v2150_v61, %v1983_v16  ;;  %v2274_v60 = vmax.f32 %v313_v19, 0.0  ;;  %v1835_v61 = vld [vmem:[%s2521_s4 + $0xe0] sm:$0xff]  ;;  %v1833_v39 = vld [vmem:[%s2521_s4 + $0xd0] sm:$0xff] }
 0x16b   :  { %351 = vst [vmem:[#allocation2 + $0x58] sm:$0xff] %v2210_v27  ;;  %1300 = vmatpush.bf16.msrb.mxu3 %v1853_v42  ;;  %v2269_v58 = vadd.f32 %v2163_v7, %v290_v54  ;;  %v2280_v63 = vmax.f32 %v314_v23, 0.0  ;;  %v508_v16 = vpack.c.bf16 %v2207_v46, %v2207_v46  ;;  %v509_v3 = vpack.c.bf16 %v333_v17, %v333_v17  ;;  %v1840_v42 = vld [vmem:[%s2521_s4 + $0x108] sm:$0xff]  ;;  %v1839_v54 = vld [vmem:[%s2521_s4 + $0x100] sm:$0xff] }
 0x16c   :  { %352 = vst [vmem:[#allocation2 + $0x60] sm:$0xff] %v2218_v32  ;;  %v2283_v0 = vadd.f32 %v2163_v7, %v291_v15  ;;  %v324_v2 = vmax.f32 %v2263_v56, 0.0  ;;  %1264 = vmatpush.bf16.msrb.mxu1 %v1835_v61  ;;  %v1832_v23 = vld [vmem:[%s2521_s4 + $0xc8] sm:$0xff]  ;;  %v510_v61 = vpack.c.bf16 %v2234_v18, %v2234_v18  ;;  %v1873_v56 = vld [vmem:[%s2521_s4 + $0x210] sm:$0xff] }
 0x16d   :  { %349 = vst [vmem:[#allocation2 + $0x48] sm:$0xff] %v333_v17  ;;  %v325_v7 = vmax.f32 %v2269_v58, 0.0  ;;  %v2297_v4 = vunpack.c.l.b16 %v508_v16  ;;  %v2300_v9 = vunpack.c.l.b16 %v509_v3 }
 0x16e   :  { %350 = vst [vmem:[#allocation2 + $0x50] sm:$0xff] %v2234_v18  ;;  %1282 = vmatpush.bf16.msrb.mxu2 %v1844_v48  ;;  %v326_v10 = vmax.f32 %v2283_v0, 0.0  ;;  %v1870_v18 = vld [vmem:[%s2521_s4 + $0x1f8] sm:$0xff] }
 0x16f   :  { %353 = vst [vmem:[#allocation2 + $0x68] sm:$0xff] %v2240_v47  ;;  %1301 = vmatpush.bf16.msrb.mxu3 %v1852_v14  ;;  %v612_v36 = vpack.c.b16 %v2300_v9, %v2297_v4  ;;  %v517_v14 = vpack.c.bf16 %v2240_v47, %v2240_v47  ;;  %v390_v47 = vpop.permute.xlu1 %389 }
 0x170   :  { %354 = vst [vmem:[#allocation2 + $0x70] sm:$0xff] %v2249_v51  ;;  %1265 = vmatpush.bf16.msrb.mxu1 %v1834_v52 }
 0x171   :  { %343 = vst [vmem:[#allocation2 + $0x18] sm:$0xff] %v2257_v55  ;;  %v400_v6 = vld [vmem:[#allocation2 + $0x3c] sm:$0xff] }
 0x172   :  { %344 = vst [vmem:[#allocation2 + $0x20] sm:$0xff] %v2266_v57  ;;  %1283 = vmatpush.bf16.msrb.mxu2 %v1843_v62  ;;  %v424_v37 = vmul.f32 %v407_v45, %v400_v6 }
 0x173   :  { %v368_v8 = vld [vmem:[#allocation2 + $0x5b] sm:$0xff]  ;;  %345 = vst [vmem:[#allocation2 + $0x28] sm:$0xff] %v2274_v60  ;;  %1302 = vmatpush.bf16.msrb.mxu3 %v1851_v1 }
 0x174   :  { %v432_v59 = vld [vmem:[#allocation2 + $0x5c] sm:$0xff]  ;;  %v401_v28 = vld [vmem:[#allocation2 + $0x44] sm:$0xff]  ;;  %346 = vst [vmem:[#allocation2 + $0x30] sm:$0xff] %v2280_v63  ;;  %v392_v34 = vmul.f32 %v375_v50, %v368_v8  ;;  %v428_v30 = vpack.c.bf16 %v424_v37, %v424_v37  ;;  %1266 = vmatpush.bf16.msrb.mxu1 %v1833_v39  ;;  %v516_v50 = vpack.c.bf16 %v2218_v32, %v2218_v32 }
 0x175   :  { %v425_v41 = vmul.f32 %v412_v38, %v401_v28  ;;  %v436_v21 = vmul.f32 %v432_v59, %v407_v45  ;;  %v1848_v32 = vld [vmem:[%s2521_s4 + $0x148] sm:$0xff]  ;;  %v403_v3 = vld [vmem:[#allocation2 + $0x54] sm:$0xff] }
 0x176   :  { %v433_v12 = vld [vmem:[#allocation2 + $0x64] sm:$0xff]  ;;  %1284 = vmatpush.bf16.msrb.mxu2 %v1842_v11  ;;  %v396_v25 = vpack.c.bf16 %v392_v34, %v392_v34  ;;  %v536_v45 = vunpack.c.l.b16 %v428_v30  ;;  %v402_v1 = vld [vmem:[#allocation2 + $0x4c] sm:$0xff]  ;;  %v2342_v8 = vunpack.c.l.b16 %v516_v50  ;;  %v385_v34 = vpop.permute.xlu0 %384  ;;  %v422_v11 = vpop.permute.xlu2 %421 }
 0x177   :  { %v369_v20 = vld [vmem:[#allocation2 + $0x63] sm:$0xff]  ;;  %v437_v22 = vmul.f32 %v433_v12, %v412_v38  ;;  %v429_v31 = vpack.c.bf16 %v425_v41, %v425_v41  ;;  %v440_v5 = vpack.c.bf16 %v436_v21, %v436_v21  ;;  %1303 = vmatpush.bf16.msrb.mxu3 %v1850_v29  ;;  %v370_v15 = vld [vmem:[#allocation2 + $0x6b] sm:$0xff]  ;;  %v371_v62 = vld [vmem:[#allocation2 + $0x73] sm:$0xff]  ;;  %v426_v21 = vmul.f32 %v417_v35, %v402_v1 }
 0x178   :  { %v393_v24 = vmul.f32 %v380_v13, %v369_v20  ;;  %v524_v43 = vunpack.c.l.b16 %v396_v25  ;;  %v434_v59 = vld [vmem:[#allocation2 + $0x6c] sm:$0xff]  ;;  %v435_v28 = vld [vmem:[#allocation2 + $0x74] sm:$0xff]  ;;  %1267 = vmatpush.bf16.msrb.mxu1 %v1832_v23  ;;  %v1831_v38 = vld [vmem:[%s2521_s4 + $0xc0] sm:$0xff]  ;;  %v394_v37 = vmul.f32 %v385_v34, %v370_v15  ;;  %v395_v41 = vmul.f32 %v390_v47, %v371_v62 }
 0x179   :  { %v441_v17 = vpack.c.bf16 %v437_v22, %v437_v22  ;;  %v537_v19 = vunpack.c.l.b16 %v429_v31  ;;  %v548_v48 = vunpack.c.l.b16 %v440_v5  ;;  %v1862_v12 = vld [vmem:[%s2521_s4 + $0x1b8] sm:$0xff]  ;;  %v2353_v13 = vunpack.c.l.b16 %v517_v14  ;;  %v1876_v14 = vld [vmem:[%s2521_s4 + $0x228] sm:$0xff]  ;;  %v1867_v62 = vld [vmem:[%s2521_s4 + $0x1e0] sm:$0xff] }
 0x17a   :  { %v397_v46 = vpack.c.bf16 %v393_v24, %v393_v24  ;;  %1285 = vmatpush.bf16.msrb.mxu2 %v1841_v33  ;;  %v511_v20 = vpack.c.bf16 %v2210_v27, %v2210_v27  ;;  %v427_v22 = vmul.f32 %v422_v11, %v403_v3  ;;  %v1847_v24 = vld [vmem:[%s2521_s4 + $0x140] sm:$0xff]  ;;  %v2360_v25 = vunpack.c.l.b16 %v510_v61  ;;  %v1878_v29 = vld [vmem:[%s2521_s4 + $0x238] sm:$0xff]  ;;  %v1869_v27 = vld [vmem:[%s2521_s4 + $0x1f0] sm:$0xff] }
 0x17b   :  { %v549_v49 = vunpack.c.l.b16 %v441_v17  ;;  %1304 = vmatpush.bf16.msrb.mxu3 %v1849_v40  ;;  %v540_v16 = vpack.c.b16 %v537_v19, %v536_v45  ;;  %v439_v52 = vmul.f32 %v435_v28, %v422_v11  ;;  %v624_v30 = vpack.c.b16 %v2353_v13, %v2342_v8  ;;  %v1868_v45 = vld [vmem:[%s2521_s4 + $0x1e8] sm:$0xff]  ;;  %v1859_v1 = vld [vmem:[%s2521_s4 + $0x1a0] sm:$0xff]  ;;  %v1858_v11 = vld [vmem:[%s2521_s4 + $0x198] sm:$0xff] }
 0x17c   :  { %v525_v44 = vunpack.c.l.b16 %v397_v46  ;;  %v438_v46 = vmul.f32 %v434_v59, %v417_v35  ;;  %v2370_v31 = vunpack.c.l.b16 %v511_v20  ;;  %1268 = vmatpush.bf16.msrb.mxu1 %v1831_v38  ;;  %v398_v33 = vpack.c.bf16 %v394_v37, %v394_v37  ;;  %v1861_v35 = vld [vmem:[%s2521_s4 + $0x1b0] sm:$0xff]  ;;  %v1866_v38 = vld [vmem:[%s2521_s4 + $0x1d8] sm:$0xff]  ;;  %v493_v0 = vld [vmem:[#allocation2 + $0x67] sm:$0xff] }
 0x17d   :  { %v552_v6 = vpack.c.b16 %v549_v49, %v548_v48  ;;  %1231 = vmatmul.bf16.vlgmr.msra.gmra.mxu2 %v540_v16  ;;  %v399_v5 = vpack.c.bf16 %v395_v41, %v395_v41  ;;  %v430_v39 = vpack.c.bf16 %v426_v21, %v426_v21  ;;  %v431_v40 = vpack.c.bf16 %v427_v22, %v427_v22  ;;  %v1860_v49 = vld [vmem:[%s2521_s4 + $0x1a8] sm:$0xff]  ;;  %v444_v16 = vld [vmem:[#allocation2 + $0x1f] sm:$0xff]  ;;  %v1857_v22 = vld [vmem:[%s2521_s4 + $0x190] sm:$0xff] }
 0x17e   :  { %1286 = vmatpush.bf16.msrb.mxu2 %v1840_v42  ;;  %v528_v53 = vpack.c.b16 %v525_v44, %v524_v43  ;;  %v613_v17 = vpack.c.b16 %v2370_v31, %v2360_v25  ;;  %v442_v42 = vpack.c.bf16 %v438_v46, %v438_v46  ;;  %v443_v43 = vpack.c.bf16 %v439_v52, %v439_v52  ;;  %v1877_v44 = vld [vmem:[%s2521_s4 + $0x230] sm:$0xff]  ;;  %v2398_v59 = vpop.permute.xlu2 %450  ;;  %v2400_v28 = vpop.permute.xlu0 %455  ;;  %v1874_v37 = vld [vmem:[%s2521_s4 + $0x218] sm:$0xff] }
 0x17f   :  { %1250 = vmatmul.bf16.vlgmr.msra.gmra.mxu3 %v552_v6  ;;  %v526_v19 = vunpack.c.l.b16 %v398_v33  ;;  %v527_v48 = vunpack.c.l.b16 %v399_v5  ;;  %v538_v50 = vunpack.c.l.b16 %v430_v39  ;;  %v539_v23 = vunpack.c.l.b16 %v431_v40  ;;  %v1875_v6 = vld [vmem:[%s2521_s4 + $0x220] sm:$0xff]  ;;  %v1872_v33 = vld [vmem:[%s2521_s4 + $0x208] sm:$0xff] }
 0x180   :  { %1212 = vmatmul.bf16.vlgmr.msra.gmra.mxu1 %v528_v53  ;;  %1305 = vmatpush.bf16.msrb.mxu3 %v1848_v32  ;;  %v550_v53 = vunpack.c.l.b16 %v442_v42  ;;  %v445_v32 = vld [vmem:[#allocation2 + $0x27] sm:$0xff]  ;;  %v468_v34 = vmul.f32 %v2398_v59, %v444_v16  ;;  %v480_v20 = vpack.c.bf16 %v324_v2, %v324_v2  ;;  %v481_v21 = vpack.c.bf16 %v325_v7, %v325_v7  ;;  %v446_v39 = vld [vmem:[#allocation2 + $0x2f] sm:$0xff]  ;;  %v447_v42 = vld [vmem:[#allocation2 + $0x37] sm:$0xff] }
 0x181   :  { %1318 = vmatpush.bf16.msra.mxu1 %v1862_v12  ;;  %v529_v15 = vpack.c.b16 %v527_v48, %v526_v19  ;;  %v541_v61 = vpack.c.b16 %v539_v23, %v538_v50  ;;  %v469_v47 = vmul.f32 %v2400_v28, %v445_v32  ;;  %v1865_v12 = vld [vmem:[%s2521_s4 + $0x1d0] sm:$0xff]  ;;  %v489_v46 = vpack.c.bf16 %v2274_v60, %v2274_v60  ;;  %v1864_v7 = vld [vmem:[%s2521_s4 + $0x1c8] sm:$0xff]  ;;  %v1871_v19 = vld [vmem:[%s2521_s4 + $0x200] sm:$0xff]  ;;  %v461_v48 = vpop.permute.xlu1 %460 }
 0x182   :  { %1287 = vmatpush.bf16.msrb.mxu2 %v1839_v54  ;;  %v551_v54 = vunpack.c.l.b16 %v443_v43  ;;  %v472_v41 = vpack.c.bf16 %v468_v34, %v468_v34  ;;  %v572_v52 = vunpack.c.l.b16 %v480_v20  ;;  %v495_v20 = vld [vmem:[#allocation2 + $0x77] sm:$0xff] }
 0x184   :  { %1306 = vmatpush.bf16.msrb.mxu3 %v1847_v24  ;;  %v553_v3 = vpack.c.b16 %v551_v54, %v550_v53  ;;  %v488_v24 = vpack.c.bf16 %v2266_v57, %v2266_v57  ;;  %v560_v2 = vunpack.c.l.b16 %v472_v41  ;;  %v1856_v57 = vld [vmem:[%s2521_s4 + $0x188] sm:$0xff]  ;;  %v482_v54 = vpack.c.bf16 %v326_v10, %v326_v10 }
 0x185   :  { %1319 = vmatpush.bf16.msra.mxu1 %v1861_v35  ;;  %v1863_v35 = vld [vmem:[%s2521_s4 + $0x1c0] sm:$0xff] }
 0x186   :  { %1337 = vmatpush.bf16.msra.mxu2 %v1870_v18  ;;  %v473_v18 = vpack.c.bf16 %v469_v47, %v469_v47  ;;  %v584_v60 = vunpack.c.l.b16 %v488_v24  ;;  %v466_v40 = vpop.permute.xlu2 %465  ;;  %v492_v47 = vld [vmem:[#allocation2 + $0x5f] sm:$0xff] }
 0x187   :  { %v471_v50 = vmul.f32 %v466_v40, %v447_v42 }
 0x188   :  { %1356 = vmatpush.bf16.msra.mxu3 %v1878_v29  ;;  %v561_v58 = vunpack.c.l.b16 %v473_v18  ;;  %v573_v29 = vunpack.c.l.b16 %v481_v21 }
 0x189   :  { %1320 = vmatpush.bf16.msra.mxu1 %v1860_v49  ;;  %v470_v49 = vmul.f32 %v461_v48, %v446_v39  ;;  %v475_v53 = vpack.c.bf16 %v471_v50, %v471_v50 }
 0x18a   :  { %1338 = vmatpush.bf16.msra.mxu2 %v1869_v27  ;;  %v585_v27 = vunpack.c.l.b16 %v489_v46  ;;  %v564_v5 = vpack.c.b16 %v561_v58, %v560_v2  ;;  %v576_v43 = vpack.c.b16 %v573_v29, %v572_v52  ;;  %v518_v58 = vpack.c.bf16 %v2249_v51, %v2249_v51 }
 0x18b   :  { %v474_v23 = vpack.c.bf16 %v470_v49, %v470_v49  ;;  %v563_v32 = vunpack.c.l.b16 %v475_v53 }
 0x18c   :  { %1357 = vmatpush.bf16.msra.mxu3 %v1877_v44  ;;  %v1855_v44 = vld [vmem:[%s2521_s4 + $0x180] sm:$0xff]  ;;  %v622_v29 = vunpack.c.l.b16 %v518_v58 }
 0x18d   :  { %1236 = vmatmul.bf16.gmra.mxu2 %v541_v61  ;;  %1321 = vmatpush.bf16.msra.mxu1 %v1859_v1  ;;  %v562_v16 = vunpack.c.l.b16 %v474_v23  ;;  %v574_v61 = vunpack.c.l.b16 %v482_v54 }
 0x18e   :  { %1339 = vmatpush.bf16.msra.mxu2 %v1868_v45  ;;  %v588_v45 = vpack.c.b16 %v585_v27, %v584_v60 }
 0x18f   :  { %1255 = vmatmul.bf16.gmra.mxu3 %v553_v3  ;;  %v565_v34 = vpack.c.b16 %v563_v32, %v562_v16 }
 0x190   :  { %1217 = vmatmul.bf16.gmra.mxu1 %v529_v15  ;;  %1358 = vmatpush.bf16.msra.mxu3 %v1876_v14  ;;  %v483_v14 = vpack.c.bf16 %v2257_v55, %v2257_v55  ;;  %v490_v15 = vpack.c.bf16 %v2280_v63, %v2280_v63  ;;  %v496_v55 = vmul.f32 %v492_v47, %v2398_v59  ;;  %v515_v59 = vld [vmem:[#allocation2 + $0x78] sm:$0xff] }
 0x191   :  { %1322 = vmatpush.bf16.msra.mxu1 %v1858_v11  ;;  %v497_v63 = vmul.f32 %v493_v0, %v2400_v28  ;;  %v519_v46 = vpack.c.bf16 %v515_v59, %v515_v59 }
 0x192   :  { %1340 = vmatpush.bf16.msra.mxu2 %v1867_v62  ;;  %v491_v62 = vpack.c.bf16 %v2205_v26, %v2205_v26  ;;  %v575_v1 = vunpack.c.l.b16 %v483_v14  ;;  %v586_v3 = vunpack.c.l.b16 %v490_v15  ;;  %v500_v11 = vpack.c.bf16 %v496_v55, %v496_v55 }
 0x193   :  { %v501_v26 = vpack.c.bf16 %v497_v63, %v497_v63 }
 0x194   :  { %1359 = vmatpush.bf16.msra.mxu3 %v1875_v6  ;;  %v587_v6 = vunpack.c.l.b16 %v491_v62 }
 0x195   :  { %1323 = vmatpush.bf16.msra.mxu1 %v1857_v22  ;;  %v597_v41 = vunpack.c.l.b16 %v501_v26  ;;  %v499_v22 = vmul.f32 %v495_v20, %v466_v40 }
 0x196   :  { %1341 = vmatpush.bf16.msra.mxu2 %v1866_v38  ;;  %v577_v38 = vpack.c.b16 %v575_v1, %v574_v61  ;;  %v589_v10 = vpack.c.b16 %v587_v6, %v586_v3 }
 0x197   :  { %v503_v24 = vpack.c.bf16 %v499_v22, %v499_v22 }
 0x198   :  { %1360 = vmatpush.bf16.msra.mxu3 %v1874_v37  ;;  %v596_v37 = vunpack.c.l.b16 %v500_v11 }
 0x199   :  { %1324 = vmatpush.bf16.msra.mxu1 %v1856_v57  ;;  %v599_v2 = vunpack.c.l.b16 %v503_v24 }
 0x19a   :  { %1342 = vmatpush.bf16.msra.mxu2 %v1865_v12  ;;  %v600_v18 = vpack.c.b16 %v597_v41, %v596_v37  ;;  %v494_v12 = vld [vmem:[#allocation2 + $0x6f] sm:$0xff] }
 0x19b   :  { %v498_v21 = vmul.f32 %v494_v12, %v461_v48 }
 0x19c   :  { %1361 = vmatpush.bf16.msra.mxu3 %v1873_v56 }
 0x19d   :  { %1288 = vmatmul.bf16.vlgmr.msrb.gmra.mxu2 %v576_v43  ;;  %1325 = vmatpush.bf16.msra.mxu1 %v1855_v44  ;;  %v502_v28 = vpack.c.bf16 %v498_v21, %v498_v21 }
 0x19e   :  { %1343 = vmatpush.bf16.msra.mxu2 %v1864_v7  ;;  %v623_v7 = vunpack.c.l.b16 %v519_v46 }
 0x19f   :  { %1307 = vmatmul.bf16.vlgmr.msrb.gmra.mxu3 %v588_v45  ;;  %v598_v56 = vunpack.c.l.b16 %v502_v28  ;;  %v1895_v28 = vmov 32.0  }
 0x1a0   :  { %1269 = vmatmul.bf16.vlgmr.msrb.gmra.mxu1 %v564_v5  ;;  %1362 = vmatpush.bf16.msra.mxu3 %v1872_v33  ;;  %v625_v4 = vpack.c.b16 %v623_v7, %v622_v29  ;;  %1889 = vrcp.f32 %v1895_v28 }
 0x1a1   :  { %v601_v52 = vpack.c.b16 %v599_v2, %v598_v56 }
 0x1a2   :  { %1344 = vmatpush.bf16.msra.mxu2 %v1863_v35 }
 0x1a4   :  { %1363 = vmatpush.bf16.msra.mxu3 %v1871_v19 }
 0x1ad   :  { %1293 = vmatmul.bf16.gmra.mxu2 %v577_v38 }
 0x1af   :  { %1312 = vmatmul.bf16.gmra.mxu3 %v589_v10 }
 0x1b0   :  { %1274 = vmatmul.bf16.gmra.mxu1 %v565_v34 }
 0x1bd   :  { %1345 = vmatmul.bf16.vlgmr.msra.gmra.mxu2 %v612_v36 }
 0x1bf   :  { %1364 = vmatmul.bf16.vlgmr.msra.gmra.mxu3 %v624_v30 }
 0x1c0   :  { %1326 = vmatmul.bf16.vlgmr.msra.gmra.mxu1 %v600_v18 }
 0x1cd   :  { %1350 = vmatmul.bf16.gmra.mxu2 %v613_v17 }
 0x1cf   :  { %1369 = vmatmul.bf16.gmra.mxu3 %v625_v4 }
 0x1d0   :  { %1331 = vmatmul.bf16.gmra.mxu1 %v601_v52 }
 0x1fd   :  { %v1213_v9 = vpop.f32.mrf.mxu1 }
 0x200   :  { %v1232_v36 = vpop.f32.mrf.mxu2 }
 0x201   :  { %v1233_v8 = vadd.f32 %v1232_v36, %v1213_v9  ;;  %v1890_v9 = vpop.eup %1889 }
 0x202   :  { %v1251_v13 = vpop.f32.mrf.mxu3  ;;  %vm1396_vm7 = vweird.f32 %v1890_v9 }
 0x203   :  { %v1252_v57 = vadd.f32 %v1251_v13, %v1233_v8 }
 0x205   :  { %v1215_v30 = vpop.f32.mrf.mxu1 }
 0x208   :  { %v1234_v60 = vpop.f32.mrf.mxu2 }
 0x209   :  { %v1235_v27 = vadd.f32 %v1234_v60, %v1215_v30 }
 0x20a   :  { %v1253_v33 = vpop.f32.mrf.mxu3 }
 0x20b   :  { %v1254_v5 = vadd.f32 %v1253_v33, %v1235_v27  ;;  %v1392_v27 = vmul.f32 32.0, %v1890_v9 }
 0x20d   :  { %v1218_v51 = vpop.f32.mrf.mxu1 }
 0x210   :  { %v1237_v35 = vpop.f32.mrf.mxu2 }
 0x211   :  { %v1238_v62 = vadd.f32 %v1237_v35, %v1218_v51 }
 0x212   :  { %v1256_v39 = vpop.f32.mrf.mxu3 }
 0x213   :  { %v1257_v61 = vadd.f32 %v1256_v39, %v1238_v62 }
 0x215   :  { %v1220_v40 = vpop.f32.mrf.mxu1 }
 0x218   :  { %v1239_v42 = vpop.f32.mrf.mxu2 }
 0x219   :  { %v1240_v47 = vadd.f32 %v1239_v42, %v1220_v40  ;;  %v1393_v40 = vsub.f32 1.0, %v1392_v27 }
 0x21a   :  { %v1258_v43 = vpop.f32.mrf.mxu3 }
 0x21b   :  { %v1259_v26 = vadd.f32 %v1258_v43, %v1240_v47 }
 0x21d   :  { %v1270_v44 = vpop.f32.mrf.mxu1 }
 0x21e   :  { %v1271_v3 = vadd.f32 %v1270_v44, %v1252_v57  ;;  %v1394_v44 = vmul.f32 %v1890_v9, %v1393_v40 }
 0x220   :  { %v1289_v25 = vpop.f32.mrf.mxu2 }
 0x221   :  { %v1290_v38 = vadd.f32 %v1289_v25, %v1271_v3 }
 0x222   :  { %v1308_v31 = vpop.f32.mrf.mxu3 }
 0x223   :  { %v1309_v37 = vadd.f32 %v1308_v31, %v1290_v38 }
 0x225   :  { %v1272_v17 = vpop.f32.mrf.mxu1 }
 0x226   :  { %v1273_v1 = vadd.f32 %v1272_v17, %v1254_v5  ;;  %v1395_v17 = vadd.f32 %v1890_v9, %v1394_v44 }
 0x228   :  { %v1291_v45 = vpop.f32.mrf.mxu2 }
 0x229   :  { %v1292_v6 = vadd.f32 %v1291_v45, %v1273_v1 }
 0x22a   :  { %v1310_v19 = vpop.f32.mrf.mxu3 }
 0x22b   :  { %v1311_v11 = vadd.f32 %v1310_v19, %v1292_v6 }
 0x22d   :  { %v1275_v48 = vpop.f32.mrf.mxu1 }
 0x22e   :  { %v1276_v34 = vadd.f32 %v1275_v48, %v1257_v61  ;;  %v1397_v48 = vsel %vm1396_vm7, %v1890_v9, %v1395_v17 }
 0x230   :  { %v1294_v49 = vpop.f32.mrf.mxu2 }
 0x231   :  { %v1295_v10 = vadd.f32 %v1294_v49, %v1276_v34 }
 0x232   :  { %v1313_v50 = vpop.f32.mrf.mxu3 }
 0x233   :  { %v1314_v41 = vadd.f32 %v1313_v50, %v1295_v10 }
 0x235   :  { %v1277_v23 = vpop.f32.mrf.mxu1 }
 0x236   :  { %v1278_v12 = vadd.f32 %v1277_v23, %v1259_v26 }
 0x238   :  { %v1296_v53 = vpop.f32.mrf.mxu2 }
 0x239   :  { %v1297_v24 = vadd.f32 %v1296_v53, %v1278_v12 }
 0x23a   :  { %v1315_v54 = vpop.f32.mrf.mxu3 }
 0x23b   :  { %v1316_v52 = vadd.f32 %v1315_v54, %v1297_v24 }
 0x23d   :  { %v1327_v14 = vpop.f32.mrf.mxu1 }
 0x23e   :  { %v1328_v20 = vadd.f32 %v1327_v14, %v1309_v37 }
 0x240   :  { %v1346_v15 = vpop.f32.mrf.mxu2 }
 0x241   :  { %v1347_v46 = vadd.f32 %v1346_v15, %v1328_v20 }
 0x242   :  { %v1365_v16 = vpop.f32.mrf.mxu3 }
 0x243   :  { %v2474_v29 = vadd.f32 %v1365_v16, %v1347_v46 }
 0x245   :  { %v1329_v32 = vpop.f32.mrf.mxu1  ;;  %v1378_v30 = vsel %vm1377_vm6, %v2474_v29, 0.0 }
 0x246   :  { %v1330_v18 = vadd.f32 %v1329_v32, %v1311_v11 }
 0x248   :  { %v1348_v0 = vpop.f32.mrf.mxu2 }
 0x249   :  { %v1349_v21 = vadd.f32 %v1348_v0, %v1330_v18 }
 0x24a   :  { %v1367_v55 = vpop.f32.mrf.mxu3 }
 0x24b   :  { %v2472_v58 = vadd.f32 %v1367_v55, %v1349_v21 }
 0x24d   :  { %v1332_v63 = vpop.f32.mrf.mxu1  ;;  %v1379_v36 = vsel %vm1377_vm6, %v2472_v58, 0.0 }
 0x24e   :  { %v1333_v22 = vadd.f32 %v1332_v63, %v1314_v41  ;;  %v1380_v33 = vadd.f32 %v1379_v36, %v1378_v30 }
 0x250   :  { %v1351_v59 = vpop.f32.mrf.mxu2 }
 0x251   :  { %v1352_v56 = vadd.f32 %v1351_v59, %v1333_v22  ;;  %v1375_v59 = vld [vmem:[%s2524_s5] sm:$0x1] }
 0x252   :  { %v1370_v2 = vpop.f32.mrf.mxu3 }
 0x253   :  { %v2476_v4 = vadd.f32 %v1370_v2, %v1352_v56  ;;  %v1376_v56 = vld [vmem:[%s2525_s6] sm:$0x1] }
 0x255   :  { %v1334_v7 = vpop.f32.mrf.mxu1  ;;  %v1381_v57 = vsel %vm1377_vm6, %v2476_v4, 0.0 }
 0x256   :  { %v1335_v8 = vadd.f32 %v1334_v7, %v1316_v52  ;;  %v1382_v35 = vadd.f32 %v1381_v57, %v1380_v33 }
 0x258   :  { %v1353_v13 = vpop.f32.mrf.mxu2 }
 0x259   :  { %v1354_v60 = vadd.f32 %v1353_v13, %v1335_v8 }
 0x25a   :  { %v1372_v51 = vpop.f32.mrf.mxu3 }
 0x25b   :  { %v1373_v5 = vadd.f32 %v1372_v51, %v1354_v60 }
 0x25d   :  { %v1383_v39 = vsel %vm1377_vm6, %v1373_v5, 0.0 }
 0x25e   :  { %v1384_v42 = vadd.f32 %v1383_v39, %v1382_v35 }
 0x260   :  { %v1385_v43 = vrot.slane %v1384_v42, 4 }
 0x262   :  { %v1386_v25 = vadd.f32 %v1385_v43, %v1384_v42 }
 0x264   :  { %v1387_v31 = vrot.slane %v1386_v25, 2 }
 0x266   :  { %v1388_v45 = vadd.f32 %v1387_v31, %v1386_v25 }
 0x268   :  { %v1389_v19 = vrot.slane %v1388_v45, 1 }
 0x26a   :  { %v1390_v49 = vadd.f32 %v1389_v19, %v1388_v45 }
 0x26c   :  { %v1398_v50 = vmul.f32 %v1397_v48, %v1390_v49 }
 0x26e   :  { %v1399_v23 = vsub.f32 %v2474_v29, %v1398_v50  ;;  %v1400_v53 = vsub.f32 %v2472_v58, %v1398_v50  ;;  %v1401_v54 = vsub.f32 %v2476_v4, %v1398_v50  ;;  %v1402_v14 = vsub.f32 %v1373_v5, %v1398_v50 }
 0x270   :  { %v1403_v15 = vmul.f32 %v1399_v23, %v1399_v23  ;;  %v1404_v62 = vmul.f32 %v1400_v53, %v1400_v53  ;;  %v1405_v16 = vmul.f32 %v1401_v54, %v1401_v54  ;;  %v1406_v32 = vmul.f32 %v1402_v14, %v1402_v14 }
 0x272   :  { %v1407_v61 = vsel %vm1377_vm6, %v1403_v15, 0.0  ;;  %v1408_v1 = vsel %vm1377_vm6, %v1404_v62, 0.0  ;;  %v1410_v6 = vsel %vm1377_vm6, %v1405_v16, 0.0  ;;  %v1412_v47 = vsel %vm1377_vm6, %v1406_v32, 0.0 }
 0x273   :  { %v1409_v3 = vadd.f32 %v1408_v1, %v1407_v61 }
 0x275   :  { %v1411_v34 = vadd.f32 %v1410_v6, %v1409_v3 }
 0x277   :  { %v1413_v0 = vadd.f32 %v1412_v47, %v1411_v34 }
 0x279   :  { %v1414_v38 = vrot.slane %v1413_v0, 4 }
 0x27b   :  { %v1415_v10 = vadd.f32 %v1414_v38, %v1413_v0 }
 0x27d   :  { %v1416_v55 = vrot.slane %v1415_v10, 2 }
 0x27f   :  { %v1417_v63 = vadd.f32 %v1416_v55, %v1415_v10 }
 0x281   :  { %v1418_v11 = vrot.slane %v1417_v63, 1 }
 0x283   :  { %v1419_v26 = vadd.f32 %v1418_v11, %v1417_v63 }
 0x285   :  { %v1420_v37 = vmul.f32 %v1419_v26, %v1397_v48 }
 0x287   :  { %v1421_v41 = vadd.f32 1e-05, %v1420_v37 }
 0x289   :  { %1891 = vrsqrt.f32 %v1421_v41  ;;  %vm1428_vm9 = vweird.f32 %v1421_v41 }
 0x28f   :  { %v1892_v18 = vpop.eup %1891 }
 0x290   :  { %v1423_v12 = vmul.f32 %v1892_v18, %v1421_v41  ;;  %vm1429_vm8 = vweird.f32 %v1892_v18 }
 0x291   :  { %vm1430_vm10 = vmor %vm1428_vm9, %vm1429_vm8 }
 0x292   :  { %v1424_v20 = vmul.f32 %v1892_v18, %v1423_v12 }
 0x294   :  { %v1425_v21 = vmul.f32 0.5, %v1424_v20 }
 0x296   :  { %v1426_v22 = vsub.f32 1.5, %v1425_v21 }
 0x298   :  { %v1427_v28 = vmul.f32 %v1892_v18, %v1426_v22 }
 0x29a   :  { %v1431_v24 = vsel %vm1430_vm10, %v1892_v18, %v1427_v28 }
 0x29b   :  { %v1432_v46 = vmul.f32 %v1431_v24, %v1375_v59 }
 0x29d   :  { %v1433_v2 = vmul.f32 %v1432_v46, %v1398_v50  ;;  %v1436_v7 = vperm.slane %v1432_v46, 0 }
 0x29f   :  { %v1434_v52 = vsub.f32 %v1376_v56, %v1433_v2  ;;  %v1438_v9 = vmul.f32 %v1436_v7, %v2474_v29  ;;  %v1439_v36 = vmul.f32 %v1436_v7, %v2472_v58  ;;  %v1440_v8 = vmul.f32 %v1436_v7, %v2476_v4 }
 0x2a0   :  { %v1441_v13 = vmul.f32 %v1436_v7, %v1373_v5 }
 0x2a1   :  { %v1443_v30 = vperm.slane %v1434_v52, 0 }
 0x2a3   :  { %v1445_v57 = vadd.f32 %v1443_v30, %v1438_v9  ;;  %v1446_v60 = vadd.f32 %v1443_v30, %v1439_v36  ;;  %v1447_v27 = vadd.f32 %v1443_v30, %v1440_v8  ;;  %v1448_v33 = vadd.f32 %v1443_v30, %v1441_v13 }
 0x2a5   :  { %v1449_v51 = vmax.f32 %v1445_v57, 0.0  ;;  %v1450_v35 = vmax.f32 %v1446_v60, 0.0  ;;  %v1451_v39 = vmax.f32 %v1447_v27, 0.0  ;;  %v1452_v40 = vmax.f32 %v1448_v33, 0.0 }
 0x2a7   :  { %1453 = vst.msk [vmem:[%s2526_s9] sm:$0xff] %vm1377_vm6, %v1449_v51 }
 0x2a8   :  { %1454 = vst.msk [vmem:[%s2526_s9 + $0x8] sm:$0xff] %vm1377_vm6, %v1450_v35 }
 0x2a9   :  { %1455 = vst.msk [vmem:[%s2526_s9 + $0x10] sm:$0xff] %vm1377_vm6, %v1451_v39 }
 0x2aa   :  { %1456 = vst.msk [vmem:[%s2526_s9 + $0x18] sm:$0xff] %vm1377_vm6, %v1452_v40 }

</bundles_post_ra>
